<compile_context>
chip_gen: v7x
topology: tpu7x:2x2x1
jax: 0.10.0
libtpu: 0.0.40
codegen_flags: <defaults>
</compile_context>

<pallas_src>
import math
import functools

import jax
import jax.numpy as jnp
from jax.experimental import pallas as pl
from jax.experimental.pallas import tpu as pltpu


def _round_up(n, m):
    return ((n + m - 1) // m) * m


def _mlp_kernel(x_ref, w1_ref, w2_ref, w3_ref, b_ref, o_ref):
    """Fused forward for one batch tile of MyModule1."""
    x = x_ref[...]                        # [bt, 9]  f32
    b1 = b_ref[0:1, :]                    # [1, 40]  f32
    b2 = b_ref[1:2, :]                    # [1, 40]  f32
    b3 = b_ref[2:3, 0:2]                  # [1, 2]   f32

    # fc1 + ReLU  (bf16 MXU inputs, f32 accumulation & epilogue)
    h = jnp.dot(x.astype(jnp.bfloat16), w1_ref[...],
                preferred_element_type=jnp.float32) + b1
    h = jnp.maximum(h, 0.0)

    # fc2 + ReLU
    h = jnp.dot(h.astype(jnp.bfloat16), w2_ref[...],
                preferred_element_type=jnp.float32) + b2
    h = jnp.maximum(h, 0.0)

    # dropout1(p=0.1): identity in eval / inference mode.
    # TODO(synk): train-mode stochastic dropout masking is intentionally not implemented.

    # fc3 (logits)
    logits = jnp.dot(h.astype(jnp.bfloat16), w3_ref[...],
                     preferred_element_type=jnp.float32) + b3   # [bt, 2]

    # 2-class softmax == sigmoid of the logit difference (exact identity);
    # avoids XLU cross-lane max/sum reductions over a width-2 (lane-padded) axis.
    d = logits[:, 1:2] - logits[:, 0:1]            # [bt, 1]
    p1 = 1.0 / (1.0 + jnp.exp(-d))                 # [bt, 1]
    p0 = 1.0 - p1
    lane = jax.lax.broadcasted_iota(jnp.int32, o_ref.shape, 1)   # [bt, 2]
    o_ref[...] = jnp.where(lane == 0, p0, p1).astype(o_ref.dtype)


@functools.partial(jax.jit, static_argnames=("b_tile",))
def mymodule1_forward(x, w1, w2, w3, bias_pack, *, b_tile=512):
    """x: [B, 9] f32; w*: bf16 [in, out]; bias_pack: f32 [3, 40]. Returns [B, 2] f32."""
    B, F = x.shape
    assert F == 9

    # Tile the batch: multiple of 8 (sublane), capped at b_tile (multiple of 256).
    bt = min(b_tile, max(8, _round_up(B, 8)))
    Bp = _round_up(B, bt)
    xp = jnp.pad(x, ((0, Bp - B), (0, 0))) if Bp != B else x
    grid = (Bp // bt,)

    flops = 2 * (9 * 40 + 40 * 40 + 40 * 2) * Bp           # 4080 flops / row
    bytes_accessed = (Bp * (9 + 2) * 4                      # x in + probs out (f32)
                      + (w1.size + w2.size + w3.size) * 2   # bf16 weights
                      + bias_pack.size * 4)                 # f32 biases
    cost = pl.CostEstimate(flops=flops, transcendentals=Bp,
                           bytes_accessed=bytes_accessed)

    out = pl.pallas_call(
        _mlp_kernel,
        out_shape=jax.ShapeDtypeStruct((Bp, 2), jnp.float32),
        grid=grid,
        in_specs=[
            pl.BlockSpec((bt, 9), lambda i: (i, 0)),          # x: tiled over batch
            pl.BlockSpec(w1.shape, lambda i: (0, 0)),          # weights: VMEM-resident
            pl.BlockSpec(w2.shape, lambda i: (0, 0)),
            pl.BlockSpec(w3.shape, lambda i: (0, 0)),
            pl.BlockSpec(bias_pack.shape, lambda i: (0, 0)),   # packed biases
        ],
        out_specs=pl.BlockSpec((bt, 2), lambda i: (i, 0)),
        compiler_params=pltpu.CompilerParams(
            dimension_semantics=("parallel",)),
        cost_estimate=cost,
    )(xp, w1, w2, w3, bias_pack)
    return out[:B]


def make_params(seed=0, bias_const=0.01):
    """xavier_uniform-style weights (stored [in, out], bf16) + packed f32 biases."""
    dims = [(9, 40), (40, 40), (40, 2)]
    key = jax.random.PRNGKey(seed)
    ws = []
    for fi, fo in dims:
        key, sub = jax.random.split(key)
        limit = math.sqrt(6.0 / (fi + fo))
        w = jax.random.uniform(sub, (fi, fo), jnp.float32, -limit, limit)
        ws.append(w.astype(jnp.bfloat16))
    bias_pack = jnp.zeros((3, 40), jnp.float32)
    bias_pack = bias_pack.at[0, :40].set(bias_const)   # fc1 bias
    bias_pack = bias_pack.at[1, :40].set(bias_const)   # fc2 bias
    bias_pack = bias_pack.at[2, :2].set(bias_const)    # fc3 bias (rest = padding)
    return ws[0], ws[1], ws[2], bias_pack


def reference_forward(x, w1, w2, w3, bias_pack):
    """Plain-JAX reference mirroring the kernel's dtype path (bf16 matmuls, f32 acc)."""
    b1 = bias_pack[0:1, :]
    b2 = bias_pack[1:2, :]
    b3 = bias_pack[2:3, 0:2]
    h = jnp.maximum(jnp.dot(x.astype(jnp.bfloat16), w1,
                            preferred_element_type=jnp.float32) + b1, 0.0)
    h = jnp.maximum(jnp.dot(h.astype(jnp.bfloat16), w2,
                            preferred_element_type=jnp.float32) + b2, 0.0)
    logits = jnp.dot(h.astype(jnp.bfloat16), w3,
                     preferred_element_type=jnp.float32) + b3
    return jax.nn.softmax(logits, axis=-1)


if __name__ == "__main__":
    params = make_params(seed=0, bias_const=0.01)
    key = jax.random.PRNGKey(0)

    # Small-batch check (single grid step) and a larger batch exercising the
    # tiled / pipelined path (grid = 2 steps of 512 rows).
    for B in (8, 1024):
        key, sub = jax.random.split(key)
        x = jax.random.normal(sub, (B, 9), dtype=jnp.float32)

        out = mymodule1_forward(x, *params)
        out = jax.block_until_ready(out)

        ref = reference_forward(x, *params)
        assert out.shape == (B, 2)
        assert jnp.allclose(out, ref, atol=1e-4, rtol=1e-4), f"mismatch vs reference (B={B})"
        # rows of the softmax output must sum to 1
        assert jnp.allclose(jnp.sum(out, axis=-1), jnp.ones((B,)), atol=1e-5)

    print("KERNEL_OK")
</pallas_src>

<mosaic_0001>
module attributes {stable_mosaic.version = 11 : i64} {
  func.func @_mlp_kernel(%arg0: i32, %arg1: memref<8x9xf32, #tpu.memory_space<vmem>>, %arg2: memref<9x40xbf16, #tpu.memory_space<vmem>>, %arg3: memref<40x40xbf16, #tpu.memory_space<vmem>>, %arg4: memref<40x2xbf16, #tpu.memory_space<vmem>>, %arg5: memref<3x40xf32, #tpu.memory_space<vmem>>, %arg6: memref<8x2xf32, #tpu.memory_space<vmem>>) attributes {dimension_semantics = [#tpu.dimension_semantics<parallel>], iteration_bounds = array<i64: 1>, scalar_prefetch = 0 : i64, scratch_operands = 0 : i64, tpu.core_type = #tpu.core_type<tc>, window_params = [{transform_indices = @transform_0, window_bounds = array<i64: 8, 9>}, {pipeline_mode = #tpu.pipeline_mode<synchronous>, transform_indices = @transform_1, window_bounds = array<i64: 9, 40>}, {pipeline_mode = #tpu.pipeline_mode<synchronous>, transform_indices = @transform_2, window_bounds = array<i64: 40, 40>}, {pipeline_mode = #tpu.pipeline_mode<synchronous>, transform_indices = @transform_3, window_bounds = array<i64: 40, 2>}, {pipeline_mode = #tpu.pipeline_mode<synchronous>, transform_indices = @transform_4, window_bounds = array<i64: 3, 40>}, {transform_indices = @transform_5, window_bounds = array<i64: 8, 2>}]} {
    %c0 = arith.constant 0 : index
    %c0_0 = arith.constant 0 : index
    %0 = vector.load %arg1[%c0, %c0_0] : memref<8x9xf32, #tpu.memory_space<vmem>>, vector<8x9xf32>
    %c0_1 = arith.constant 0 : index
    %c0_2 = arith.constant 0 : index
    %1 = vector.load %arg5[%c0_1, %c0_2] : memref<3x40xf32, #tpu.memory_space<vmem>>, vector<1x40xf32>
    %c1 = arith.constant 1 : index
    %c0_3 = arith.constant 0 : index
    %2 = vector.load %arg5[%c1, %c0_3] : memref<3x40xf32, #tpu.memory_space<vmem>>, vector<1x40xf32>
    %c2 = arith.constant 2 : index
    %c0_4 = arith.constant 0 : index
    %3 = vector.load %arg5[%c2, %c0_4] : memref<3x40xf32, #tpu.memory_space<vmem>>, vector<1x2xf32>
    %4 = arith.truncf %0 : vector<8x9xf32> to vector<8x9xbf16>
    %c0_5 = arith.constant 0 : index
    %c0_6 = arith.constant 0 : index
    %5 = vector.load %arg2[%c0_5, %c0_6] : memref<9x40xbf16, #tpu.memory_space<vmem>>, vector<9x40xbf16>
    %cst = arith.constant dense<0.000000e+00> : vector<8x40xf32>
    %6 = tpu.matmul %4, %5, %cst {dimension_numbers = #tpu.dot_dimension_numbers<[1], [0], [0], [1], [0, 0, 1, 1], [], []>} : vector<8x9xbf16>, vector<9x40xbf16>, vector<8x40xf32> -> vector<8x40xf32>
    %7 = vector.broadcast %1 : vector<1x40xf32> to vector<8x40xf32>
    %8 = arith.addf %6, %7 : vector<8x40xf32>
    %cst_7 = arith.constant 0.000000e+00 : f32
    %9 = vector.broadcast %cst_7 : f32 to vector<8x40xf32>
    %10 = arith.maximumf %8, %9 : vector<8x40xf32>
    %11 = arith.truncf %10 : vector<8x40xf32> to vector<8x40xbf16>
    %c0_8 = arith.constant 0 : index
    %c0_9 = arith.constant 0 : index
    %12 = vector.load %arg3[%c0_8, %c0_9] : memref<40x40xbf16, #tpu.memory_space<vmem>>, vector<40x40xbf16>
    %cst_10 = arith.constant dense<0.000000e+00> : vector<8x40xf32>
    %13 = tpu.matmul %11, %12, %cst_10 {dimension_numbers = #tpu.dot_dimension_numbers<[1], [0], [0], [1], [0, 0, 1, 1], [], []>} : vector<8x40xbf16>, vector<40x40xbf16>, vector<8x40xf32> -> vector<8x40xf32>
    %14 = vector.broadcast %2 : vector<1x40xf32> to vector<8x40xf32>
    %15 = arith.addf %13, %14 : vector<8x40xf32>
    %cst_11 = arith.constant 0.000000e+00 : f32
    %16 = vector.broadcast %cst_11 : f32 to vector<8x40xf32>
    %17 = arith.maximumf %15, %16 : vector<8x40xf32>
    %18 = arith.truncf %17 : vector<8x40xf32> to vector<8x40xbf16>
    %c0_12 = arith.constant 0 : index
    %c0_13 = arith.constant 0 : index
    %19 = vector.load %arg4[%c0_12, %c0_13] : memref<40x2xbf16, #tpu.memory_space<vmem>>, vector<40x2xbf16>
    %cst_14 = arith.constant dense<0.000000e+00> : vector<8x2xf32>
    %20 = tpu.matmul %18, %19, %cst_14 {dimension_numbers = #tpu.dot_dimension_numbers<[1], [0], [0], [1], [0, 0, 1, 1], [], []>} : vector<8x40xbf16>, vector<40x2xbf16>, vector<8x2xf32> -> vector<8x2xf32>
    %21 = vector.broadcast %3 : vector<1x2xf32> to vector<8x2xf32>
    %22 = arith.addf %20, %21 : vector<8x2xf32>
    %23 = vector.extract_strided_slice %22 {offsets = [0, 1], sizes = [8, 1], strides = [1, 1]} : vector<8x2xf32> to vector<8x1xf32>
    %24 = vector.extract_strided_slice %22 {offsets = [0, 0], sizes = [8, 1], strides = [1, 1]} : vector<8x2xf32> to vector<8x1xf32>
    %25 = arith.subf %23, %24 : vector<8x1xf32>
    %cst_15 = arith.constant 0.000000e+00 : f32
    %26 = vector.broadcast %cst_15 : f32 to vector<8x1xf32>
    %27 = arith.subf %26, %25 : vector<8x1xf32>
    %28 = math.exp %27 : vector<8x1xf32>
    %cst_16 = arith.constant 1.000000e+00 : f32
    %29 = vector.broadcast %cst_16 : f32 to vector<8x1xf32>
    %30 = arith.addf %29, %28 : vector<8x1xf32>
    %cst_17 = arith.constant 1.000000e+00 : f32
    %31 = vector.broadcast %cst_17 : f32 to vector<8x1xf32>
    %32 = arith.divf %31, %30 : vector<8x1xf32>
    %cst_18 = arith.constant 1.000000e+00 : f32
    %33 = vector.broadcast %cst_18 : f32 to vector<8x1xf32>
    %34 = arith.subf %33, %32 : vector<8x1xf32>
    %35 = tpu.iota {dimensions = array<i32: 1>} : vector<8x2xi32>
    %c0_i32 = arith.constant 0 : i32
    %36 = vector.broadcast %c0_i32 : i32 to vector<8x2xi32>
    %37 = arith.cmpi eq, %35, %36 : vector<8x2xi32>
    %38 = vector.shape_cast %34 : vector<8x1xf32> to vector<8x1xf32>
    %39 = vector.broadcast %38 : vector<8x1xf32> to vector<8x2xf32>
    %40 = vector.shape_cast %32 : vector<8x1xf32> to vector<8x1xf32>
    %41 = vector.broadcast %40 : vector<8x1xf32> to vector<8x2xf32>
    %42 = arith.select %37, %39, %41 : vector<8x2xi1>, vector<8x2xf32>
    %c0_19 = arith.constant 0 : index
    %c0_20 = arith.constant 0 : index
    %43 = vector.load %arg6[%c0_19, %c0_20] : memref<8x2xf32, #tpu.memory_space<vmem>>, vector<8x2xf32>
    tpu.vector_store %arg6[%c0_19, %c0_20], %42 {strides = array<i32>} : memref<8x2xf32, #tpu.memory_space<vmem>>, vector<8x2xf32>,
    return
  }
  func.func @transform_0(%arg0: i32) -> (i32, i32) {
    %c0_i32 = arith.constant 0 : i32
    %c0_i32_0 = arith.constant 0 : i32
    return %arg0, %c0_i32 : i32, i32
  }
  func.func @transform_1(%arg0: i32) -> (i32, i32) {
    %c0_i32 = arith.constant 0 : i32
    %c0_i32_0 = arith.constant 0 : i32
    %c0_i32_1 = arith.constant 0 : i32
    return %c0_i32, %c0_i32_0 : i32, i32
  }
  func.func @transform_2(%arg0: i32) -> (i32, i32) {
    %c0_i32 = arith.constant 0 : i32
    %c0_i32_0 = arith.constant 0 : i32
    %c0_i32_1 = arith.constant 0 : i32
    return %c0_i32, %c0_i32_0 : i32, i32
  }
  func.func @transform_3(%arg0: i32) -> (i32, i32) {
    %c0_i32 = arith.constant 0 : i32
    %c0_i32_0 = arith.constant 0 : i32
    %c0_i32_1 = arith.constant 0 : i32
    return %c0_i32, %c0_i32_0 : i32, i32
  }
  func.func @transform_4(%arg0: i32) -> (i32, i32) {
    %c0_i32 = arith.constant 0 : i32
    %c0_i32_0 = arith.constant 0 : i32
    %c0_i32_1 = arith.constant 0 : i32
    return %c0_i32, %c0_i32_0 : i32, i32
  }
  func.func @transform_5(%arg0: i32) -> (i32, i32) {
    %c0_i32 = arith.constant 0 : i32
    %c0_i32_0 = arith.constant 0 : i32
    return %arg0, %c0_i32 : i32, i32
  }
}

</mosaic_0001>

<bundles_post_ra>
// kernel: mymodule1_forward.1
= control target key start
LH: loop header
LB: loop body
LE: loop exit
PB: predicated region body
PF: predicated region fallthrough
CT: control target
= control target key end

     0   :  { %10 = vsyncpa [#allocation3], 0  ;;  %s374_s18 = smov [#allocation2]   ;;  %s465_s0 = inlined_call_operand.vmem [shape: f32[8,9], index: 0, kind: input, shape index: {}]   ;;  %s466_s1 = inlined_call_operand.hbm [shape: bf16[9,40], index: 1, kind: input, shape index: {}]   ;;  %s467_s2 = inlined_call_operand.vmem [shape: bf16[40,40], index: 2, kind: input, shape index: {}]   ;;  %s468_s3 = inlined_call_operand.vmem [shape: bf16[40,2], index: 3, kind: input, shape index: {}]   ;;  %s469_s4 = inlined_call_operand.vmem [shape: f32[3,40], index: 4, kind: input, shape index: {}]   ;;  %s470_s5 = inlined_call_operand.vmem [shape: f32[8,2], index: 5, kind: output, shape index: {}]  }
   0x1   :  { %s18_s19 = sshll.u32 %s374_s18, 4  ;;  %s350_s22 = scalar_lea.hbm %s466_s1, 128  ;;  %s19_s19 = int_to_ptr.vmem [resolvable:$true] %s18_s19 }
   0x2   :  { %p351_p0 = scmp.ne.s32.totalorder %s466_s1, %s350_s22  ;;  %p354_p1 = scmp.lt.u32.totalorder %s350_s22, %s466_s1 }
   0x4   :  { %p356_p2 = pnand %p354_p1, %p351_p0 }
   0x6   :  { %359 = shalt.err (!%p356_p2)
}
   0x7   :  { %s360_s27 = scalar_lea.vmem %s19_s19, 128  ;;  %p365_p4 = scmp.lt.s32.totalorder %s19_s19, %s19_s19 }
   0x8   :  { %p361_p3 = scmp.ne.s32.totalorder %s19_s19, %s360_s27  ;;  %p366_p5 = scmp.lt.s32.totalorder %s360_s27, %s360_s27 }
   0xa   :  { %p367_p6 = por %p366_p5, %p365_p4 }
   0xc   :  { %p368_p7 = pnand %p367_p6, %p361_p3 }
   0xe   :  { %371 = shalt.err (!%p368_p7)
}
   0xf   :  { %s375_s28 = smov 64   ;;  %s376_s29 = smov 4  }
  0x10   :  { %24 = dma.hbm_to_vmem [thread:$0]  %s466_s1, 128, %s19_s19, [#allocation3], %s375_s28, %s375_s28, %s376_s29  }
  0x11   :  { %372 = dma.done.wait [#allocation3], 128  }
  0x12   :  { %373 = vsyncadd [#allocation3], 4294967168  ;;  %vm55_vm0 = vcmask 1043456   ;;  %v377_v0 = vmov 0.0   ;;  %vm378_vm1 = vmmov 0   ;;  %vm56_vm2 = vcmask 1044480  }
  0x13   :  { %303 = vmatprep.subr.bf16.mxu0 %v377_v0  ;;  %309 = vmatprep.subr.bf16.mxu1 %v377_v0  ;;  %v379_v1 = vmov 65535   ;;  %v339_v4 = vld [vmem:[#allocation2] sm:$0x1f]   ;;  %vm51_vm3 = vcmask 72704   ;;  %v341_v9 = vld [vmem:[%s467_s2 + $0x8] sm:$0xff]   ;;  %vm128_vm4 = vcmask 326656   ;;  %v259_v47 = vlaneseq }
  0x14   :  { %305 = vmatprep.mubr.msk.bf16.mxu0 %vm378_vm1, %v377_v0  ;;  %315 = vmatprep.mubr.msk.bf16.mxu1 %vm378_vm1, %v377_v0  ;;  %v57_v2 = vsel %vm55_vm0, 4294967295, %v379_v1  ;;  %v35_v5 = vld [vmem:[%s465_s0] sm:$0xff]  ;;  %v342_v10 = vld [vmem:[%s467_s2 + $0x10] ss:$0 sps:$4 sm:$0xff]   ;;  %v344_v21 = vld [vmem:[%s468_s3 + $0x8] sm:$0xff]   ;;  %v381_v38 = vmov 1  }
  0x15   :  { %v58_v3 = vsel %vm56_vm2, %v57_v2, 0  ;;  %v340_v7 = vld [vmem:[%s467_s2] sm:$0xff]   ;;  %v39_v8 = vpack.c.bf16 %v35_v5, %v35_v5  ;;  %v133_v11 = vsel %vm55_vm0, %v342_v10, 0  ;;  %v345_v22 = vld [vmem:[%s468_s3 + $0x10] ss:$0 sps:$4 sm:$0xff]   ;;  %338 = vset.pattern.permute.xlu1 %v381_v38  ;;  %337 = vset.pattern.permute.xlu0 %v381_v38  ;;  %v260_v48 = vand.u32 127, %v259_v47 }
  0x16   :  { %v60_v6 = vand.u32 %v339_v4, %v58_v3  ;;  %310 = vmatpush3.bf16.msra.mxu1 %v340_v7  ;;  %v343_v12 = vld [vmem:[%s468_s3] sm:$0xff]   ;;  %v205_v23 = vsel %vm55_vm0, %v345_v22, 0  ;;  %s380_s3 = smov 1   ;;  %vm273_vm6 = vcmask 15360  }
  0x17   :  { %311 = vmatprep.subr.bf16.mxu1 %v377_v0  ;;  %v280_v13 = vld [vmem:[%s469_s4] ss:$0 sm:$0xff]  ;;  %v283_v24 = vld [vmem:[%s469_s4 + $0x1] ss:$0 sm:$0xff]  ;;  %v288_v32 = vld [vmem:[%s469_s4 + $0x2] ss:$0 sm:$0xff] }
  0x18   :  { %304 = vmatpush3.bf16.msra.mxu0 %v60_v6  ;;  %vm261_vm5 = vcmp.eq.s32.totalorder %v260_v48, 0 }
  0x19   :  { %319 = vmatprep.subr.bf16.mxu0 %v377_v0 }
  0x1a   :  { %312 = vmatpush3.bf16.msra.mxu1 %v341_v9 }
  0x1b   :  { %306 = vmatmul.mubr.msk.bf16.vlgmr.msra.gmra.mrb[0].mxu0 %vm51_vm3, %v39_v8  ;;  %313 = vmatprep.subr.bf16.mxu1 %v377_v0 }
  0x1c   :  { %325 = vmatprep.mubr.msk.bf16.mxu0 %vm378_vm1, %v377_v0  ;;  %320 = vmatpush3.bf16.msra.mxu0 %v343_v12 }
  0x1d   :  { %321 = vmatprep.subr.bf16.mxu0 %v377_v0 }
  0x1e   :  { %314 = vmatpush3.bf16.msra.mxu1 %v133_v11 }
  0x20   :  { %322 = vmatpush3.bf16.msra.mxu0 %v344_v21 }
  0x21   :  { %323 = vmatprep.subr.bf16.mxu0 %v377_v0 }
  0x24   :  { %324 = vmatpush3.bf16.msra.mxu0 %v205_v23 }
  0xee   :  { %v96_v14 = vpop.f32.mrb[0].mxu0 }
  0xef   :  { %v97_v15 = vadd.f32 %v280_v13, %v96_v14  ;;  %v307_v16 = vpop.f32.mrb[1].mxu0 }
  0xf0   :  { %v99_v17 = vpop.f32.mrb[2].mxu0 }
  0xf1   :  { %v102_v18 = vmax.f32 %v97_v15, 0.0  ;;  %v308_v19 = vpop.f32.mrb[3].mxu0 }
  0xf3   :  { %v103_v20 = vpack.c.bf16 %v102_v18, %v102_v18 }
  0xf5   :  { %316 = vmatmul.mubr.msk.bf16.vlgmr.msra.gmra.mrb[0].mxu1 %vm128_vm4, %v103_v20 }
 0x1c8   :  { %v169_v25 = vpop.f32.mrb[0].mxu1 }
 0x1c9   :  { %v170_v26 = vadd.f32 %v283_v24, %v169_v25  ;;  %v317_v27 = vpop.f32.mrb[1].mxu1 }
 0x1ca   :  { %v172_v28 = vpop.f32.mrb[2].mxu1 }
 0x1cb   :  { %v175_v29 = vmax.f32 %v170_v26, 0.0  ;;  %v318_v30 = vpop.f32.mrb[3].mxu1 }
 0x1cd   :  { %v176_v31 = vpack.c.bf16 %v175_v29, %v175_v29 }
 0x1cf   :  { %326 = vmatmul.mubr.msk.bf16.vlgmr.msra.gmra.mrb[4].mxu0 %vm128_vm4, %v176_v31 }
 0x2a2   :  { %v241_v33 = vpop.f32.mrb[4].mxu0 }
 0x2a3   :  { %v242_v34 = vadd.f32 %v288_v32, %v241_v33  ;;  %v327_v35 = vpop.f32.mrb[5].mxu0 }
 0x2a4   :  { %v244_v36 = vpop.f32.mrb[6].mxu0 }
 0x2a5   :  { %248 = vrot.lane.b32.xlu0 %v242_v34, %s380_s3  ;;  %v328_v37 = vpop.f32.mrb[7].mxu0 }
 0x317   :  { %v249_v39 = vpop.permute.xlu0 %248 }
 0x318   :  { %v251_v40 = vsub.f32 %v242_v34, %v249_v39 }
 0x31a   :  { %v252_v41 = vsub.f32 0.0, %v251_v40 }
 0x31c   :  { %v253_v42 = vmul.f32 1.442695, %v252_v41 }
 0x31e   :  { %346 = vpow2.f32 %v253_v42 }
 0x328   :  { %v347_v43 = vpop.eup %346 }
 0x329   :  { %v255_v44 = vadd.f32 1.0, %v347_v43 }
 0x32b   :  { %348 = vrcp.f32 %v255_v44 }
 0x335   :  { %v349_v45 = vpop.eup %348 }
 0x336   :  { %269 = vperm.xlu1 %338, %v349_v45   ;;  %v258_v46 = vsub.f32 1.0, %v349_v45 }
 0x338   :  { %264 = vperm.xlu0 %337, %v258_v46  }
 0x3b5   :  { %v270_v49 = vpop.permute.xlu1 %269 }
 0x3b7   :  { %v265_v50 = vpop.permute.xlu0 %264 }
 0x3b8   :  { %v272_v51 = vsel %vm261_vm5, %v265_v50, %v270_v49 }
 0x3b9   :  { %274 = vst.msk [vmem:[%s470_s5] sm:$0xff] %vm273_vm6, %v272_v51 }
 0x3ba   :  { %279 = vsyncpa [#allocation3], 1 }

</bundles_post_ra>
